<compile_context>
chip_gen: v6e
topology: v6e:2x2x1
jax: 0.10.0
libtpu: 0.0.40
codegen_flags: <defaults>
</compile_context>

<pallas_src>
import numpy as np
import jax
import jax.numpy as jnp
from jax import lax
from jax.experimental import pallas as pl
from jax.experimental.pallas import tpu as pltpu


def _r128(v):
    return ((v + 127) // 128) * 128


# ----------------------------- fused Pallas kernel ---------------------------

def _make_fused_kernel(N, H, W, Cin_p, C1, C2, KH, KW, LQp, YOFF, YCOLS):
    """Fused conv3x3(pad=1)+ReLU -> conv3x3(pad=1)+ReLU over the flat padded layout."""
    Hp, Wp = H + 2, W + 2
    P0 = Wp + 1                       # absolute flat index of output pixel (n=0,h=0,w=0)
    # lane offset of each 3x3 tap in the flat zero-padded layout (row-major, per image)
    taps = [(ki - 1) * Wp + (kj - 1) for ki in range(KH) for kj in range(KW)]

    def kernel(x_ref, w1_ref, b1_ref, w2_ref, b2_ref, o_ref, y_ref):
        # ---- conv1: stack the 9 tap slices on the contraction axis -> ONE MXU dot ---
        # x_ref column m holds absolute padded index m; window j covers absolute P0+j.
        rhs1 = jnp.concatenate(
            [x_ref[:, P0 + d:P0 + d + LQp] for d in taps], axis=0)      # (9*Cin_p, LQp)
        h1 = jnp.dot(w1_ref[...], rhs1, preferred_element_type=jnp.float32)
        h1 = jnp.maximum(h1 + b1_ref[...], 0.0)                         # (C1, LQp)

        # ---- validity mask rebuilt in-kernel: iota / mul / floor / cmp on the VPU ---
        # Absolute index a = P0 + lane; valid iff it is a real image pixel (not padding
        # ring, not wrap-around between images).  Pure f32 math, no integer div/rem.
        lane = lax.broadcasted_iota(jnp.int32, (1, LQp), 1)
        a = lane.astype(jnp.float32) + float(P0)
        n_img = jnp.floor((a + 0.5) * (1.0 / (Hp * Wp)))
        q = a - n_img * float(Hp * Wp)
        row = jnp.floor((q + 0.5) * (1.0 / Wp))
        col = q - row * float(Wp)
        valid = ((row >= 1.0) & (row <= float(H)) &
                 (col >= 1.0) & (col <= float(W)) & (n_img <= float(N - 1)))
        h1 = jnp.where(valid, h1, 0.0)

        # ---- conv1 activation -> VMEM flat slab: 3 aligned, unmasked stores --------
        # y_ref column m holds absolute padded index (m - YOFF + P0); data lands at the
        # 128-aligned offset YOFF, margins are zeroed so conv2 taps read true zeros.
        y_ref[:, :YOFF] = jnp.zeros((C1, YOFF), jnp.float32)
        y_ref[:, YOFF:YOFF + LQp] = h1
        y_ref[:, YOFF + LQp:] = jnp.zeros((C1, YCOLS - YOFF - LQp), jnp.float32)

        # ---- conv2: same stacked-tap trick, ONE MXU dot, one lane-dense store ------
        rhs2 = jnp.concatenate(
            [y_ref[:, YOFF + d:YOFF + d + LQp] for d in taps], axis=0)  # (9*C1, LQp)
        h2 = jnp.dot(w2_ref[...], rhs2, preferred_element_type=jnp.float32)
        o_ref[...] = jnp.maximum(h2 + b2_ref[...], 0.0)                 # (C2, LQp)

    return kernel


@jax.jit
def hidden_output_forward(x_nchw, params):
    """Conv3x3+ReLU -> Conv3x3+ReLU -> Flatten (PyTorch NCHW flatten order)."""
    N, Cin, H, W = x_nchw.shape
    C1, C2 = params["w1"].shape[0], params["w2"].shape[0]
    KH, KW = params["w1"].shape[2], params["w1"].shape[3]
    Hp, Wp = H + 2, W + 2
    P0 = Wp + 1
    LP = N * Hp * Wp                                   # flat padded length      (648)
    LQp = _r128(LP - P0)                               # lane-dense output window (640)
    Cin_p = max(8, ((Cin + 7) // 8) * 8)               # sublane-aligned in-channels (8)
    XCOLS = _r128(max(LP, P0 + (Wp + 1) + LQp))        # input slab width        (768)
    YOFF = _r128(P0)                                   # activation data offset  (128)
    YCOLS = _r128(YOFF + (Wp + 1) + LQp)               # activation slab width   (896)

    kernel = _make_fused_kernel(N, H, W, Cin_p, C1, C2, KH, KW, LQp, YOFF, YCOLS)

    # one-time parameter re-layout: stacked-tap (Cout, 9*Cin) matrices, column biases
    w1t = jnp.transpose(params["w1"], (0, 2, 3, 1))                       # (C1,KH,KW,Cin)
    w1t = jnp.pad(w1t, ((0, 0), (0, 0), (0, 0), (0, Cin_p - Cin)))        # pad Cin -> 8
    w1s = w1t.reshape(C1, KH * KW * Cin_p)                                # (8, 72)
    w2s = jnp.transpose(params["w2"], (0, 2, 3, 1)).reshape(C2, KH * KW * C1)  # (16, 72)
    b1c = params["b1"].reshape(C1, 1)
    b2c = params["b2"].reshape(C2, 1)

    # tiny input prep: zero-pad spatially, flatten to lane-dense (Cin_p, XCOLS)
    # TODO(synk): could be folded into the kernel; kept in XLA since it is ~16 KB.
    xp = jnp.pad(x_nchw, ((0, 0), (0, 0), (1, 1), (1, 1)))                # (N,Cin,Hp,Wp)
    xf = jnp.transpose(xp, (1, 0, 2, 3)).reshape(Cin, LP)                 # (Cin, 648)
    xbuf = jnp.pad(xf, ((0, Cin_p - Cin), (0, XCOLS - LP)))               # (8, 768)

    flops = 2 * LQp * (C1 * KH * KW * Cin_p + C2 * KH * KW * C1)
    bytes_accessed = 4 * (Cin_p * XCOLS + C1 * KH * KW * Cin_p + C1
                          + C2 * KH * KW * C1 + C2 + C2 * LQp)

    out = pl.pallas_call(
        kernel,
        out_shape=jax.ShapeDtypeStruct((C2, LQp), jnp.float32),
        grid_spec=pltpu.PrefetchScalarGridSpec(
            num_scalar_prefetch=0,
            grid=(1,),                        # single grid step: everything resident
            in_specs=[
                pl.BlockSpec((Cin_p, XCOLS), lambda i: (0, 0)),            # input slab
                pl.BlockSpec((C1, KH * KW * Cin_p), lambda i: (0, 0)),     # conv1 weights
                pl.BlockSpec((C1, 1), lambda i: (0, 0)),                   # bias1 column
                pl.BlockSpec((C2, KH * KW * C1), lambda i: (0, 0)),        # conv2 weights
                pl.BlockSpec((C2, 1), lambda i: (0, 0)),                   # bias2 column
            ],
            out_specs=pl.BlockSpec((C2, LQp), lambda i: (0, 0)),
            scratch_shapes=[pltpu.VMEM((C1, YCOLS), jnp.float32)],         # conv1 act slab
        ),
        compiler_params=pltpu.CompilerParams(
            dimension_semantics=("arbitrary",)),
        cost_estimate=pl.CostEstimate(flops=flops, transcendentals=0,
                                      bytes_accessed=bytes_accessed),
    )(xbuf, w1s, b1c, w2s, b2c)

    # crop the lane-dense padded slab to (N, C2, H, W), then the PyTorch NCHW flatten
    full = jnp.pad(out[:, :LP - P0], ((0, 0), (P0, 0)))                   # (C2, LP)
    full = full.reshape(C2, N, Hp, Wp)[:, :, 1:H + 1, 1:W + 1]            # (C2, N, H, W)
    return jnp.transpose(full, (1, 0, 2, 3)).reshape(N, C2 * H * W)


# ------------------------------- reference -----------------------------------

def reference_forward(x_nchw, params):
    dn = lax.conv_dimension_numbers(x_nchw.shape, params["w1"].shape,
                                    ("NCHW", "OIHW", "NCHW"))
    y = lax.conv_general_dilated(x_nchw, params["w1"], (1, 1),
                                 ((1, 1), (1, 1)), dimension_numbers=dn)
    y = jnp.maximum(y + params["b1"][None, :, None, None], 0.0)
    y = lax.conv_general_dilated(y, params["w2"], (1, 1),
                                 ((1, 1), (1, 1)), dimension_numbers=dn)
    y = jnp.maximum(y + params["b2"][None, :, None, None], 0.0)
    return y.reshape(y.shape[0], -1)


# --------------------------------- main ---------------------------------------

if __name__ == "__main__":
    key = jax.random.PRNGKey(0)
    k_x, k_w1, k_b1, k_w2, k_b2 = jax.random.split(key, 5)

    N, Cin, H, W = 2, 4, 16, 16
    C1, C2 = 8, 16

    x = jax.random.normal(k_x, (N, Cin, H, W), dtype=jnp.float32)
    params = {
        "w1": 0.1 * jax.random.normal(k_w1, (C1, Cin, 3, 3), dtype=jnp.float32),
        "b1": 0.1 * jax.random.normal(k_b1, (C1,), dtype=jnp.float32),
        "w2": 0.1 * jax.random.normal(k_w2, (C2, C1, 3, 3), dtype=jnp.float32),
        "b2": 0.1 * jax.random.normal(k_b2, (C2,), dtype=jnp.float32),
    }

    out = jax.block_until_ready(hidden_output_forward(x, params))
    ref = jax.block_until_ready(reference_forward(x, params))

    assert out.shape == (N, C2 * H * W), out.shape
    assert jnp.allclose(out, ref, atol=1e-4, rtol=1e-4), \
        float(jnp.max(jnp.abs(out - ref)))

    print("KERNEL_OK")
</pallas_src>

<mosaic_0001>
module attributes {stable_mosaic.version = 11 : i64} {
  func.func @kernel(%arg0: i32, %arg1: memref<8x768xf32, #tpu.memory_space<vmem>>, %arg2: memref<8x72xf32, #tpu.memory_space<vmem>>, %arg3: memref<8x1xf32, #tpu.memory_space<vmem>>, %arg4: memref<16x72xf32, #tpu.memory_space<vmem>>, %arg5: memref<16x1xf32, #tpu.memory_space<vmem>>, %arg6: memref<16x640xf32, #tpu.memory_space<vmem>>, %arg7: memref<8x896xf32, #tpu.memory_space<vmem>>) attributes {dimension_semantics = [#tpu.dimension_semantics<arbitrary>], iteration_bounds = array<i64: 1>, scalar_prefetch = 0 : i64, scratch_operands = 1 : i64, tpu.core_type = #tpu.core_type<tc>, window_params = [{pipeline_mode = #tpu.pipeline_mode<synchronous>, transform_indices = @transform_0, window_bounds = array<i64: 8, 768>}, {pipeline_mode = #tpu.pipeline_mode<synchronous>, transform_indices = @transform_1, window_bounds = array<i64: 8, 72>}, {pipeline_mode = #tpu.pipeline_mode<synchronous>, transform_indices = @transform_2, window_bounds = array<i64: 8, 1>}, {pipeline_mode = #tpu.pipeline_mode<synchronous>, transform_indices = @transform_3, window_bounds = array<i64: 16, 72>}, {pipeline_mode = #tpu.pipeline_mode<synchronous>, transform_indices = @transform_4, window_bounds = array<i64: 16, 1>}, {pipeline_mode = #tpu.pipeline_mode<synchronous>, transform_indices = @transform_5, window_bounds = array<i64: 16, 640>}]} {
    %c0 = arith.constant 0 : index
    %c0_0 = arith.constant 0 : index
    %0 = vector.load %arg1[%c0, %c0_0] : memref<8x768xf32, #tpu.memory_space<vmem>>, vector<8x640xf32>
    %c0_1 = arith.constant 0 : index
    %c1 = arith.constant 1 : index
    %1 = vector.load %arg1[%c0_1, %c1] : memref<8x768xf32, #tpu.memory_space<vmem>>, vector<8x640xf32>
    %c0_2 = arith.constant 0 : index
    %c2 = arith.constant 2 : index
    %2 = vector.load %arg1[%c0_2, %c2] : memref<8x768xf32, #tpu.memory_space<vmem>>, vector<8x640xf32>
    %c0_3 = arith.constant 0 : index
    %c18 = arith.constant 18 : index
    %3 = vector.load %arg1[%c0_3, %c18] : memref<8x768xf32, #tpu.memory_space<vmem>>, vector<8x640xf32>
    %c0_4 = arith.constant 0 : index
    %c19 = arith.constant 19 : index
    %4 = vector.load %arg1[%c0_4, %c19] : memref<8x768xf32, #tpu.memory_space<vmem>>, vector<8x640xf32>
    %c0_5 = arith.constant 0 : index
    %c20 = arith.constant 20 : index
    %5 = vector.load %arg1[%c0_5, %c20] : memref<8x768xf32, #tpu.memory_space<vmem>>, vector<8x640xf32>
    %c0_6 = arith.constant 0 : index
    %c36 = arith.constant 36 : index
    %6 = vector.load %arg1[%c0_6, %c36] : memref<8x768xf32, #tpu.memory_space<vmem>>, vector<8x640xf32>
    %c0_7 = arith.constant 0 : index
    %c37 = arith.constant 37 : index
    %7 = vector.load %arg1[%c0_7, %c37] : memref<8x768xf32, #tpu.memory_space<vmem>>, vector<8x640xf32>
    %c0_8 = arith.constant 0 : index
    %c38 = arith.constant 38 : index
    %8 = vector.load %arg1[%c0_8, %c38] : memref<8x768xf32, #tpu.memory_space<vmem>>, vector<8x640xf32>
    %9 = tpu.concatenate %0, %1, %2, %3, %4, %5, %6, %7, %8 in 0 : vector<8x640xf32>, vector<8x640xf32>, vector<8x640xf32>, vector<8x640xf32>, vector<8x640xf32>, vector<8x640xf32>, vector<8x640xf32>, vector<8x640xf32>, vector<8x640xf32> -> vector<72x640xf32>
    %c0_9 = arith.constant 0 : index
    %c0_10 = arith.constant 0 : index
    %10 = vector.load %arg2[%c0_9, %c0_10] : memref<8x72xf32, #tpu.memory_space<vmem>>, vector<8x72xf32>
    %cst = arith.constant dense<0.000000e+00> : vector<8x640xf32>
    %11 = tpu.matmul %10, %9, %cst {dimension_numbers = #tpu.dot_dimension_numbers<[1], [0], [0], [1], [0, 0, 1, 1], [], []>} : vector<8x72xf32>, vector<72x640xf32>, vector<8x640xf32> -> vector<8x640xf32>
    %c0_11 = arith.constant 0 : index
    %c0_12 = arith.constant 0 : index
    %12 = vector.load %arg3[%c0_11, %c0_12] : memref<8x1xf32, #tpu.memory_space<vmem>>, vector<8x1xf32>
    %13 = vector.broadcast %12 : vector<8x1xf32> to vector<8x640xf32>
    %14 = arith.addf %11, %13 : vector<8x640xf32>
    %cst_13 = arith.constant 0.000000e+00 : f32
    %15 = vector.broadcast %cst_13 : f32 to vector<8x640xf32>
    %16 = arith.maximumf %14, %15 : vector<8x640xf32>
    %17 = tpu.iota {dimensions = array<i32: 1>} : vector<1x640xi32>
    %18 = arith.sitofp %17 : vector<1x640xi32> to vector<1x640xf32>
    %cst_14 = arith.constant 1.900000e+01 : f32
    %19 = vector.broadcast %cst_14 : f32 to vector<1x640xf32>
    %20 = arith.addf %18, %19 : vector<1x640xf32>
    %cst_15 = arith.constant 5.000000e-01 : f32
    %21 = vector.broadcast %cst_15 : f32 to vector<1x640xf32>
    %22 = arith.addf %20, %21 : vector<1x640xf32>
    %cst_16 = arith.constant 0.00308641978 : f32
    %23 = vector.broadcast %cst_16 : f32 to vector<1x640xf32>
    %24 = arith.mulf %22, %23 : vector<1x640xf32>
    %25 = math.floor %24 : vector<1x640xf32>
    %cst_17 = arith.constant 3.240000e+02 : f32
    %26 = vector.broadcast %cst_17 : f32 to vector<1x640xf32>
    %27 = arith.mulf %25, %26 : vector<1x640xf32>
    %28 = arith.subf %20, %27 : vector<1x640xf32>
    %cst_18 = arith.constant 5.000000e-01 : f32
    %29 = vector.broadcast %cst_18 : f32 to vector<1x640xf32>
    %30 = arith.addf %28, %29 : vector<1x640xf32>
    %cst_19 = arith.constant 0.055555556 : f32
    %31 = vector.broadcast %cst_19 : f32 to vector<1x640xf32>
    %32 = arith.mulf %30, %31 : vector<1x640xf32>
    %33 = math.floor %32 : vector<1x640xf32>
    %cst_20 = arith.constant 1.800000e+01 : f32
    %34 = vector.broadcast %cst_20 : f32 to vector<1x640xf32>
    %35 = arith.mulf %33, %34 : vector<1x640xf32>
    %36 = arith.subf %28, %35 : vector<1x640xf32>
    %cst_21 = arith.constant 1.000000e+00 : f32
    %37 = vector.broadcast %cst_21 : f32 to vector<1x640xf32>
    %38 = arith.cmpf oge, %33, %37 : vector<1x640xf32>
    %cst_22 = arith.constant 1.600000e+01 : f32
    %39 = vector.broadcast %cst_22 : f32 to vector<1x640xf32>
    %40 = arith.cmpf ole, %33, %39 : vector<1x640xf32>
    %41 = arith.andi %38, %40 : vector<1x640xi1>
    %cst_23 = arith.constant 1.000000e+00 : f32
    %42 = vector.broadcast %cst_23 : f32 to vector<1x640xf32>
    %43 = arith.cmpf oge, %36, %42 : vector<1x640xf32>
    %44 = arith.andi %41, %43 : vector<1x640xi1>
    %cst_24 = arith.constant 1.600000e+01 : f32
    %45 = vector.broadcast %cst_24 : f32 to vector<1x640xf32>
    %46 = arith.cmpf ole, %36, %45 : vector<1x640xf32>
    %47 = arith.andi %44, %46 : vector<1x640xi1>
    %cst_25 = arith.constant 1.000000e+00 : f32
    %48 = vector.broadcast %cst_25 : f32 to vector<1x640xf32>
    %49 = arith.cmpf ole, %25, %48 : vector<1x640xf32>
    %50 = arith.andi %47, %49 : vector<1x640xi1>
    %cst_26 = arith.constant 0.000000e+00 : f32
    %51 = vector.shape_cast %50 : vector<1x640xi1> to vector<1x640xi1>
    %52 = vector.broadcast %51 : vector<1x640xi1> to vector<8x640xi1>
    %53 = vector.broadcast %cst_26 : f32 to vector<8x640xf32>
    %54 = arith.select %52, %16, %53 : vector<8x640xi1>, vector<8x640xf32>
    %cst_27 = arith.constant 0.000000e+00 : f32
    %55 = vector.broadcast %cst_27 : f32 to vector<8x128xf32>
    %c0_28 = arith.constant 0 : index
    %c0_29 = arith.constant 0 : index
    %56 = vector.load %arg7[%c0_28, %c0_29] : memref<8x896xf32, #tpu.memory_space<vmem>>, vector<8x128xf32>
    tpu.vector_store %arg7[%c0_28, %c0_29], %55 {strides = array<i32>} : memref<8x896xf32, #tpu.memory_space<vmem>>, vector<8x128xf32>,
    %c0_30 = arith.constant 0 : index
    %c128 = arith.constant 128 : index
    %57 = vector.load %arg7[%c0_30, %c128] : memref<8x896xf32, #tpu.memory_space<vmem>>, vector<8x640xf32>
    tpu.vector_store %arg7[%c0_30, %c128], %54 {strides = array<i32>} : memref<8x896xf32, #tpu.memory_space<vmem>>, vector<8x640xf32>,
    %cst_31 = arith.constant 0.000000e+00 : f32
    %58 = vector.broadcast %cst_31 : f32 to vector<8x128xf32>
    %c0_32 = arith.constant 0 : index
    %c768 = arith.constant 768 : index
    %59 = vector.load %arg7[%c0_32, %c768] : memref<8x896xf32, #tpu.memory_space<vmem>>, vector<8x128xf32>
    tpu.vector_store %arg7[%c0_32, %c768], %58 {strides = array<i32>} : memref<8x896xf32, #tpu.memory_space<vmem>>, vector<8x128xf32>,
    %c0_33 = arith.constant 0 : index
    %c109 = arith.constant 109 : index
    %60 = vector.load %arg7[%c0_33, %c109] : memref<8x896xf32, #tpu.memory_space<vmem>>, vector<8x640xf32>
    %c0_34 = arith.constant 0 : index
    %c110 = arith.constant 110 : index
    %61 = vector.load %arg7[%c0_34, %c110] : memref<8x896xf32, #tpu.memory_space<vmem>>, vector<8x640xf32>
    %c0_35 = arith.constant 0 : index
    %c111 = arith.constant 111 : index
    %62 = vector.load %arg7[%c0_35, %c111] : memref<8x896xf32, #tpu.memory_space<vmem>>, vector<8x640xf32>
    %c0_36 = arith.constant 0 : index
    %c127 = arith.constant 127 : index
    %63 = vector.load %arg7[%c0_36, %c127] : memref<8x896xf32, #tpu.memory_space<vmem>>, vector<8x640xf32>
    %c0_37 = arith.constant 0 : index
    %c128_38 = arith.constant 128 : index
    %64 = vector.load %arg7[%c0_37, %c128_38] : memref<8x896xf32, #tpu.memory_space<vmem>>, vector<8x640xf32>
    %c0_39 = arith.constant 0 : index
    %c129 = arith.constant 129 : index
    %65 = vector.load %arg7[%c0_39, %c129] : memref<8x896xf32, #tpu.memory_space<vmem>>, vector<8x640xf32>
    %c0_40 = arith.constant 0 : index
    %c145 = arith.constant 145 : index
    %66 = vector.load %arg7[%c0_40, %c145] : memref<8x896xf32, #tpu.memory_space<vmem>>, vector<8x640xf32>
    %c0_41 = arith.constant 0 : index
    %c146 = arith.constant 146 : index
    %67 = vector.load %arg7[%c0_41, %c146] : memref<8x896xf32, #tpu.memory_space<vmem>>, vector<8x640xf32>
    %c0_42 = arith.constant 0 : index
    %c147 = arith.constant 147 : index
    %68 = vector.load %arg7[%c0_42, %c147] : memref<8x896xf32, #tpu.memory_space<vmem>>, vector<8x640xf32>
    %69 = tpu.concatenate %60, %61, %62, %63, %64, %65, %66, %67, %68 in 0 : vector<8x640xf32>, vector<8x640xf32>, vector<8x640xf32>, vector<8x640xf32>, vector<8x640xf32>, vector<8x640xf32>, vector<8x640xf32>, vector<8x640xf32>, vector<8x640xf32> -> vector<72x640xf32>
    %c0_43 = arith.constant 0 : index
    %c0_44 = arith.constant 0 : index
    %70 = vector.load %arg4[%c0_43, %c0_44] : memref<16x72xf32, #tpu.memory_space<vmem>>, vector<16x72xf32>
    %cst_45 = arith.constant dense<0.000000e+00> : vector<16x640xf32>
    %71 = tpu.matmul %70, %69, %cst_45 {dimension_numbers = #tpu.dot_dimension_numbers<[1], [0], [0], [1], [0, 0, 1, 1], [], []>} : vector<16x72xf32>, vector<72x640xf32>, vector<16x640xf32> -> vector<16x640xf32>
    %c0_46 = arith.constant 0 : index
    %c0_47 = arith.constant 0 : index
    %72 = vector.load %arg5[%c0_46, %c0_47] : memref<16x1xf32, #tpu.memory_space<vmem>>, vector<16x1xf32>
    %73 = vector.broadcast %72 : vector<16x1xf32> to vector<16x640xf32>
    %74 = arith.addf %71, %73 : vector<16x640xf32>
    %cst_48 = arith.constant 0.000000e+00 : f32
    %75 = vector.broadcast %cst_48 : f32 to vector<16x640xf32>
    %76 = arith.maximumf %74, %75 : vector<16x640xf32>
    %c0_49 = arith.constant 0 : index
    %c0_50 = arith.constant 0 : index
    %77 = vector.load %arg6[%c0_49, %c0_50] : memref<16x640xf32, #tpu.memory_space<vmem>>, vector<16x640xf32>
    tpu.vector_store %arg6[%c0_49, %c0_50], %76 {strides = array<i32>} : memref<16x640xf32, #tpu.memory_space<vmem>>, vector<16x640xf32>,
    return
  }
  func.func @transform_0(%arg0: i32) -> (i32, i32) {
    %c0_i32 = arith.constant 0 : i32
    %c0_i32_0 = arith.constant 0 : i32
    %c0_i32_1 = arith.constant 0 : i32
    return %c0_i32, %c0_i32_0 : i32, i32
  }
  func.func @transform_1(%arg0: i32) -> (i32, i32) {
    %c0_i32 = arith.constant 0 : i32
    %c0_i32_0 = arith.constant 0 : i32
    %c0_i32_1 = arith.constant 0 : i32
    return %c0_i32, %c0_i32_0 : i32, i32
  }
  func.func @transform_2(%arg0: i32) -> (i32, i32) {
    %c0_i32 = arith.constant 0 : i32
    %c0_i32_0 = arith.constant 0 : i32
    %c0_i32_1 = arith.constant 0 : i32
    return %c0_i32, %c0_i32_0 : i32, i32
  }
  func.func @transform_3(%arg0: i32) -> (i32, i32) {
    %c0_i32 = arith.constant 0 : i32
    %c0_i32_0 = arith.constant 0 : i32
    %c0_i32_1 = arith.constant 0 : i32
    return %c0_i32, %c0_i32_0 : i32, i32
  }
  func.func @transform_4(%arg0: i32) -> (i32, i32) {
    %c0_i32 = arith.constant 0 : i32
    %c0_i32_0 = arith.constant 0 : i32
    %c0_i32_1 = arith.constant 0 : i32
    return %c0_i32, %c0_i32_0 : i32, i32
  }
  func.func @transform_5(%arg0: i32) -> (i32, i32) {
    %c0_i32 = arith.constant 0 : i32
    %c0_i32_0 = arith.constant 0 : i32
    %c0_i32_1 = arith.constant 0 : i32
    return %c0_i32, %c0_i32_0 : i32, i32
  }
}

</mosaic_0001>

<bundles_post_ra>
// kernel: hidden_output_forward.1
= control target key start
LH: loop header
LB: loop body
LE: loop exit
PB: predicated region body
PF: predicated region fallthrough
CT: control target
= control target key end

     0   :  { %s1297_s22 = smov 90   ;;  %s1298_s25 = smov 91   ;;  %v1304_v5 = vmov 0.0   ;;  %v1306_v7 = vmov 0   ;;  %vm210_vm0 = vcmask 736256   ;;  %vm1987_vm1 = vcmask 744448   ;;  %s1977_s0 = inlined_call_operand.vmem [shape: f32[8,768], index: 0, kind: input, shape index: {}]   ;;  %s1978_s2 = inlined_call_operand.vmem [shape: f32[8,1], index: 2, kind: input, shape index: {}]   ;;  %s1979_s1 = inlined_call_operand.vmem [shape: f32[8,72], index: 1, kind: input, shape index: {}]   ;;  %s1980_s4 = inlined_call_operand.vmem [shape: f32[16,1], index: 4, kind: input, shape index: {}]   ;;  %s1981_s3 = inlined_call_operand.vmem [shape: f32[16,72], index: 3, kind: input, shape index: {}]   ;;  %s1982_s5 = inlined_call_operand.vmem [shape: f32[16,640], index: 5, kind: output, shape index: {}]  }
   0x1   :  { %v1342_v0 = vld [vmem:[%s1977_s0 + $0x8] sm:$0xff]  ;;  %v1347_v1 = vld [vmem:[%s1977_s0] sm:$0xff]  ;;  %v1356_v2 = vld [vmem:[%s1977_s0 + $0x10] sm:$0xff]  ;;  %s1299_s26 = smov 92   ;;  %s1300_s6 = smov 108   ;;  %296 = vmatprep.mubr.f32.mxu0 %v1304_v5  ;;  %367 = vmatprep.mubr.f32.mxu1 %v1304_v5  ;;  %vm1986_vm2 = vcmask 752640  }
   0x2   :  { %200 = vrot.lane.b32.xlu0 %v1342_v0, %s1297_s22  ;;  %198 = vrot.lane.b32.xlu1 %v1347_v1, %s1297_s22  ;;  %v1373_v3 = vld [vmem:[%s1977_s0 + $0x18] sm:$0xff]  ;;  %v1378_v4 = vld [vmem:[%s1977_s0 + $0x20] sm:$0xff]  ;;  %s1301_s7 = smov 109   ;;  %s1302_s8 = smov 110   ;;  %vm1985_vm3 = vcmask 883712   ;;  %vm1984_vm4 = vcmask 891904  }
   0x3   :  { %s1303_s9 = smov 126   ;;  %s1305_s10 = smov 127   ;;  %v30_v6 = vld [vmem:[%s1977_s0 + $0x28] sm:$0xff]  ;;  %1295 = vset.pattern.permute.xlu0 %v1306_v7  ;;  %1296 = vset.pattern.permute.xlu1 %v1306_v7  ;;  %v222_v8 = vld [vmem:[%s1978_s2] sm:$0xff]  ;;  %vm95_vm5 = vcmask 900096   ;;  %vm72_vm6 = vcmask 1031168  }
   0x4   :  { %vm49_vm7 = vcmask 1039360   ;;  %vm1983_vm8 = vcmask 588800   ;;  %vm1307_vm9 = vmmov 0  }
   0x6   :  { %202 = vrot.lane.b32.xlu0 %v1356_v2, %s1297_s22  ;;  %177 = vrot.lane.b32.xlu1 %v1342_v0, %s1298_s25 }
   0xa   :  { %179 = vrot.lane.b32.xlu0 %v1356_v2, %s1298_s25  ;;  %175 = vrot.lane.b32.xlu1 %v1347_v1, %s1298_s25 }
   0xe   :  { %154 = vrot.lane.b32.xlu0 %v1342_v0, %s1299_s26  ;;  %156 = vrot.lane.b32.xlu1 %v1356_v2, %s1299_s26 }
  0x12   :  { %204 = vrot.lane.b32.xlu0 %v1373_v3, %s1297_s22  ;;  %206 = vrot.lane.b32.xlu1 %v1378_v4, %s1297_s22 }
  0x16   :  { %152 = vrot.lane.b32.xlu0 %v1347_v1, %s1299_s26  ;;  %131 = vrot.lane.b32.xlu1 %v1342_v0, %s1300_s6 }
  0x1a   :  { %133 = vrot.lane.b32.xlu0 %v1356_v2, %s1300_s6  ;;  %181 = vrot.lane.b32.xlu1 %v1373_v3, %s1298_s25 }
  0x1e   :  { %183 = vrot.lane.b32.xlu0 %v1378_v4, %s1298_s25  ;;  %129 = vrot.lane.b32.xlu1 %v1347_v1, %s1300_s6 }
  0x22   :  { %108 = vrot.lane.b32.xlu0 %v1342_v0, %s1301_s7  ;;  %110 = vrot.lane.b32.xlu1 %v1356_v2, %s1301_s7 }
  0x26   :  { %158 = vrot.lane.b32.xlu0 %v1373_v3, %s1299_s26  ;;  %160 = vrot.lane.b32.xlu1 %v1378_v4, %s1299_s26 }
  0x2a   :  { %106 = vrot.lane.b32.xlu0 %v1347_v1, %s1301_s7  ;;  %85 = vrot.lane.b32.xlu1 %v1342_v0, %s1302_s8 }
  0x2e   :  { %87 = vrot.lane.b32.xlu0 %v1356_v2, %s1302_s8  ;;  %135 = vrot.lane.b32.xlu1 %v1373_v3, %s1300_s6 }
  0x32   :  { %137 = vrot.lane.b32.xlu0 %v1378_v4, %s1300_s6  ;;  %83 = vrot.lane.b32.xlu1 %v1347_v1, %s1302_s8 }
  0x36   :  { %62 = vrot.lane.b32.xlu0 %v1342_v0, %s1303_s9  ;;  %64 = vrot.lane.b32.xlu1 %v1356_v2, %s1303_s9 }
  0x3a   :  { %112 = vrot.lane.b32.xlu0 %v1373_v3, %s1301_s7  ;;  %114 = vrot.lane.b32.xlu1 %v1378_v4, %s1301_s7 }
  0x3e   :  { %60 = vrot.lane.b32.xlu0 %v1347_v1, %s1303_s9  ;;  %39 = vrot.lane.b32.xlu1 %v1342_v0, %s1305_s10 }
  0x42   :  { %41 = vrot.lane.b32.xlu0 %v1356_v2, %s1305_s10  ;;  %89 = vrot.lane.b32.xlu1 %v1373_v3, %s1302_s8 }
  0x46   :  { %91 = vrot.lane.b32.xlu0 %v1378_v4, %s1302_s8  ;;  %37 = vrot.lane.b32.xlu1 %v1347_v1, %s1305_s10 }
  0x4a   :  { %66 = vrot.lane.b32.xlu0 %v1373_v3, %s1303_s9  ;;  %68 = vrot.lane.b32.xlu1 %v1378_v4, %s1303_s9 }
  0x4e   :  { %43 = vrot.lane.b32.xlu0 %v1373_v3, %s1305_s10  ;;  %45 = vrot.lane.b32.xlu1 %v1378_v4, %s1305_s10 }
  0x52   :  { %208 = vrot.lane.b32.xlu0 %v30_v6, %s1297_s22  ;;  %185 = vrot.lane.b32.xlu1 %v30_v6, %s1298_s25 }
  0x56   :  { %162 = vrot.lane.b32.xlu0 %v30_v6, %s1299_s26  ;;  %139 = vrot.lane.b32.xlu1 %v30_v6, %s1300_s6 }
  0x5a   :  { %116 = vrot.lane.b32.xlu0 %v30_v6, %s1301_s7  ;;  %93 = vrot.lane.b32.xlu1 %v30_v6, %s1302_s8 }
  0x5e   :  { %70 = vrot.lane.b32.xlu0 %v30_v6, %s1303_s9  ;;  %47 = vrot.lane.b32.xlu1 %v30_v6, %s1305_s10 }
  0x62   :  { %225 = vperm.xlu0 %1295, %v222_v8   ;;  %732 = vrot.lane.b32.xlu1 %v1304_v5, %s1297_s22 }
  0x66   :  { %634 = vrot.lane.b32.xlu0 %v1304_v5, %s1302_s8  ;;  %698 = vrot.lane.b32.xlu1 %v1304_v5, %s1299_s26 }
  0x6a   :  { %617 = vrot.lane.b32.xlu0 %v1304_v5, %s1303_s9 }
  0x6e   :  { %600 = vrot.lane.b32.xlu0 %v1304_v5, %s1305_s10 }
  0x72   :  { %715 = vrot.lane.b32.xlu0 %v1304_v5, %s1298_s25 }
  0x74   :  { %v201_v9 = vpop.permute.xlu0 %200  ;;  %v199_v10 = vpop.permute.xlu1 %198 }
  0x75   :  { %v211_v14 = vsel %vm210_vm0, %v199_v10, %v201_v9 }
  0x76   :  { %681 = vrot.lane.b32.xlu0 %v1304_v5, %s1300_s6 }
  0x78   :  { %v203_v11 = vpop.permute.xlu0 %202  ;;  %v178_v12 = vpop.permute.xlu1 %177 }
  0x79   :  { %v212_v13 = vsel %vm210_vm0, %v201_v9, %v203_v11 }
  0x7a   :  { %246 = vmatprep.subr.mxu0 %v212_v13 }
  0x7b   :  { %247 = vmatpush1.msra.mxu0 %v211_v14 }
  0x7c   :  { %v180_v15 = vpop.permute.xlu0 %179  ;;  %v176_v16 = vpop.permute.xlu1 %175 }
  0x7d   :  { %v189_v17 = vsel %vm1987_vm1, %v178_v12, %v180_v15  ;;  %v188_v18 = vsel %vm1987_vm1, %v176_v16, %v178_v12  ;;  %v221_v16 = vld [vmem:[%s1979_s1] sm:$0xff]  ;;  %s1308_s1 = smov 19  }
  0x7e   :  { %248 = vmatprep.subr.mxu0 %v189_v17  ;;  %753 = vrot.lane.b32.xlu1 %v1304_v5, %s1308_s1 }
  0x7f   :  { %249 = vmatpush1.msra.mxu0 %v188_v18 }
  0x80   :  { %v155_v19 = vpop.permute.xlu0 %154  ;;  %v157_v20 = vpop.permute.xlu1 %156 }
  0x81   :  { %v166_v21 = vsel %vm1986_vm2, %v155_v19, %v157_v20 }
  0x82   :  { %250 = vmatprep.subr.mxu0 %v166_v21 }
  0x84   :  { %v205_v22 = vpop.permute.xlu0 %204  ;;  %v1481_v23 = vpop.permute.xlu1 %206 }
  0x85   :  { %v214_v24 = vsel %vm210_vm0, %v205_v22, %v1481_v23  ;;  %v213_v25 = vsel %vm210_vm0, %v203_v11, %v205_v22 }
  0x86   :  { %317 = vmatprep.subr.mxu1 %v214_v24 }
  0x87   :  { %318 = vmatpush1.msra.mxu1 %v213_v25 }
  0x88   :  { %v153_v26 = vpop.permute.xlu0 %152  ;;  %v132_v27 = vpop.permute.xlu1 %131 }
  0x89   :  { %v165_v28 = vsel %vm1986_vm2, %v153_v26, %v155_v19 }
  0x8a   :  { %251 = vmatpush1.msra.mxu0 %v165_v28 }
  0x8c   :  { %v134_v29 = vpop.permute.xlu0 %133  ;;  %v182_v30 = vpop.permute.xlu1 %181 }
  0x8d   :  { %v143_v31 = vsel %vm1985_vm3, %v132_v27, %v134_v29  ;;  %v190_v36 = vsel %vm1987_vm1, %v180_v15, %v182_v30 }
  0x8e   :  { %252 = vmatprep.subr.mxu0 %v143_v31 }
  0x90   :  { %v1488_v32 = vpop.permute.xlu0 %183  ;;  %v130_v33 = vpop.permute.xlu1 %129 }
  0x91   :  { %v142_v34 = vsel %vm1985_vm3, %v130_v33, %v132_v27  ;;  %v191_v35 = vsel %vm1987_vm1, %v182_v30, %v1488_v32 }
  0x92   :  { %253 = vmatpush1.msra.mxu0 %v142_v34  ;;  %319 = vmatprep.subr.mxu1 %v191_v35 }
  0x93   :  { %320 = vmatpush1.msra.mxu1 %v190_v36 }
  0x94   :  { %v109_v37 = vpop.permute.xlu0 %108  ;;  %v111_v38 = vpop.permute.xlu1 %110 }
  0x95   :  { %v120_v39 = vsel %vm1984_vm4, %v109_v37, %v111_v38 }
  0x96   :  { %254 = vmatprep.subr.mxu0 %v120_v39 }
  0x98   :  { %v159_v40 = vpop.permute.xlu0 %158  ;;  %v1495_v41 = vpop.permute.xlu1 %160 }
  0x99   :  { %v168_v42 = vsel %vm1986_vm2, %v159_v40, %v1495_v41  ;;  %v167_v43 = vsel %vm1986_vm2, %v157_v20, %v159_v40 }
  0x9a   :  { %321 = vmatprep.subr.mxu1 %v168_v42 }
  0x9b   :  { %322 = vmatpush1.msra.mxu1 %v167_v43 }
  0x9c   :  { %v107_v44 = vpop.permute.xlu0 %106  ;;  %v86_v45 = vpop.permute.xlu1 %85 }
  0x9d   :  { %v119_v46 = vsel %vm1984_vm4, %v107_v44, %v109_v37  ;;  %v449_v37 = vlaneseq }
  0x9e   :  { %255 = vmatpush1.msra.mxu0 %v119_v46 }
  0xa0   :  { %v88_v47 = vpop.permute.xlu0 %87  ;;  %v136_v48 = vpop.permute.xlu1 %135 }
  0xa1   :  { %v97_v49 = vsel %vm95_vm5, %v86_v45, %v88_v47  ;;  %v144_v54 = vsel %vm1985_vm3, %v134_v29, %v136_v48 }
  0xa2   :  { %256 = vmatprep.subr.mxu0 %v97_v49 }
  0xa4   :  { %v1502_v50 = vpop.permute.xlu0 %137  ;;  %v84_v51 = vpop.permute.xlu1 %83 }
  0xa5   :  { %v96_v52 = vsel %vm95_vm5, %v84_v51, %v86_v45  ;;  %v145_v53 = vsel %vm1985_vm3, %v136_v48, %v1502_v50 }
  0xa6   :  { %257 = vmatpush1.msra.mxu0 %v96_v52  ;;  %323 = vmatprep.subr.mxu1 %v145_v53 }
  0xa7   :  { %324 = vmatpush1.msra.mxu1 %v144_v54 }
  0xa8   :  { %v63_v55 = vpop.permute.xlu0 %62  ;;  %v65_v56 = vpop.permute.xlu1 %64 }
  0xa9   :  { %v74_v57 = vsel %vm72_vm6, %v63_v55, %v65_v56 }
  0xaa   :  { %258 = vmatprep.subr.mxu0 %v74_v57 }
  0xac   :  { %v113_v58 = vpop.permute.xlu0 %112  ;;  %v1509_v59 = vpop.permute.xlu1 %114 }
  0xad   :  { %v122_v60 = vsel %vm1984_vm4, %v113_v58, %v1509_v59  ;;  %v121_v61 = vsel %vm1984_vm4, %v111_v38, %v113_v58  ;;  %v1561_v38 = vand.u32 127, %v449_v37 }
  0xae   :  { %325 = vmatprep.subr.mxu1 %v122_v60 }
  0xaf   :  { %326 = vmatpush1.msra.mxu1 %v121_v61  ;;  %v455_v39 = vcvt.s32.f32 %v1561_v38  ;;  %v451_v52 = vadd.s32 128, %v1561_v38 }
  0xb0   :  { %v61_v62 = vpop.permute.xlu0 %60  ;;  %v40_v63 = vpop.permute.xlu1 %39 }
  0xb1   :  { %v73_v6 = vsel %vm72_vm6, %v61_v62, %v63_v55  ;;  %v460_v40 = vadd.f32 19.0, %v455_v39  ;;  %v456_v55 = vcvt.s32.f32 %v451_v52 }
  0xb2   :  { %259 = vmatpush1.msra.mxu0 %v73_v6 }
  0xb3   :  { %v465_v42 = vadd.f32 0.5, %v460_v40  ;;  %v461_v58 = vadd.f32 19.0, %v456_v55 }
  0xb4   :  { %v42_v8 = vpop.permute.xlu0 %41  ;;  %v90_v9 = vpop.permute.xlu1 %89 }
  0xb5   :  { %v51_v10 = vsel %vm49_vm7, %v40_v63, %v42_v8  ;;  %v98_v15 = vsel %vm95_vm5, %v88_v47, %v90_v9  ;;  %v470_v44 = vmul.f32 0.0030864198, %v465_v42  ;;  %v466_v61 = vadd.f32 0.5, %v461_v58 }
  0xb6   :  { %260 = vmatprep.subr.mxu0 %v51_v10 }
  0xb7   :  { %v475_v45 = vfloor.f32 %v470_v44  ;;  %v1566_v6 = vmul.f32 0.0030864198, %v466_v61 }
  0xb8   :  { %v92_v11 = vpop.permute.xlu0 %91  ;;  %v38_v12 = vpop.permute.xlu1 %37 }
  0xb9   :  { %v50_v13 = vsel %vm49_vm7, %v38_v12, %v40_v63  ;;  %v99_v14 = vsel %vm95_vm5, %v90_v9, %v92_v11  ;;  %v480_v47 = vmul.f32 324.0, %v475_v45  ;;  %v476_v9 = vfloor.f32 %v1566_v6 }
  0xba   :  { %261 = vmatpush1.msra.mxu0 %v50_v13  ;;  %327 = vmatprep.subr.mxu1 %v99_v14 }
  0xbb   :  { %262 = vmatprep.subr.mxu0 %v1342_v0  ;;  %328 = vmatpush1.msra.mxu1 %v98_v15  ;;  %v485_v49 = vsub.f32 %v460_v40, %v480_v47  ;;  %v481_v12 = vmul.f32 324.0, %v476_v9 }
  0xbc   :  { %v67_v17 = vpop.permute.xlu0 %66  ;;  %v69_v18 = vpop.permute.xlu1 %68  ;;  %263 = vmatpush1.msra.mxu0 %v1347_v1 }
  0xbd   :  { %1211 = vmatmul.mubr.msk.f32.vlgmr.msra.gmra.mxu0 %vm1983_vm8, %v221_v16  ;;  %v76_v19 = vsel %vm72_vm6, %v67_v17, %v69_v18  ;;  %v75_v20 = vsel %vm72_vm6, %v65_v56, %v67_v17  ;;  %1241 = vmatprep.subr.mxu0 %v1304_v5  ;;  %v490_v51 = vadd.f32 0.5, %v485_v49  ;;  %v486_v15 = vsub.f32 %v461_v58, %v481_v12 }
  0xbe   :  { %329 = vmatprep.subr.mxu1 %v76_v19  ;;  %1259 = vmatprep.mubr.msk.f32.mxu0 %vm1307_vm9, %v1304_v5 }
  0xbf   :  { %330 = vmatpush1.msra.mxu1 %v75_v20  ;;  %v495_v54 = vmul.f32 0.055555556, %v490_v51  ;;  %v491_v20 = vadd.f32 0.5, %v486_v15 }
  0xc0   :  { %v44_v21 = vpop.permute.xlu0 %43  ;;  %v46_v0 = vpop.permute.xlu1 %45 }
  0xc1   :  { %v53_v22 = vsel %vm49_vm7, %v44_v21, %v46_v0  ;;  %v52_v24 = vsel %vm49_vm7, %v42_v8, %v44_v21  ;;  %v500_v57 = vfloor.f32 %v495_v54 }
  0xc2   :  { %331 = vmatprep.subr.mxu1 %v53_v22 }
  0xc3   :  { %332 = vmatpush1.msra.mxu1 %v52_v24  ;;  %v505_v60 = vmul.f32 18.0, %v500_v57  ;;  %vm515_vm10 = vcmp.ge.f32.partialorder %v500_v57, 1.0  ;;  %vm520_vm11 = vcmp.le.f32.partialorder %v500_v57, 16.0  ;;  %v496_v24 = vmul.f32 0.055555556, %v491_v20 }
  0xc4   :  { %v209_v1 = vpop.permute.xlu0 %208  ;;  %v186_v25 = vpop.permute.xlu1 %185  ;;  %333 = vmatprep.subr.mxu1 %v1373_v3  ;;  %vm525_vm12 = vmand %vm515_vm10, %vm520_vm11 }
  0xc5   :  { %v215_v26 = vsel %vm210_vm0, %v1481_v23, %v209_v1  ;;  %334 = vmatpush1.msra.mxu1 %v1356_v2  ;;  %v192_v27 = vsel %vm1987_vm1, %v1488_v32, %v186_v25  ;;  %v510_v63 = vsub.f32 %v485_v49, %v505_v60  ;;  %v454_v25 = vadd.s32 512, %v1561_v38 }
  0xc6   :  { %1212 = vmatmul.mubr.msk.f32.vlgmr.msra.gmra.mxu1 %vm1983_vm8, %v221_v16  ;;  %1242 = vmatpush3.msra.mxu0 %v215_v26 }
  0xc7   :  { %1243 = vmatprep.subr.mxu0 %v1304_v5  ;;  %1022 = vmatprep.mubr.f32.mxu1 %v1304_v5  ;;  %vm530_vm13 = vcmp.ge.f32.partialorder %v510_v63, 1.0  ;;  %vm540_vm15 = vcmp.le.f32.partialorder %v510_v63, 16.0 }
  0xc8   :  { %v163_v28 = vpop.permute.xlu0 %162  ;;  %v140_v29 = vpop.permute.xlu1 %139  ;;  %1244 = vmatpush3.msra.mxu0 %v192_v27  ;;  %vm535_vm14 = vmand %vm525_vm12, %vm530_vm13  ;;  %v501_v27 = vfloor.f32 %v496_v24 }
  0xc9   :  { %v169_v3 = vsel %vm1986_vm2, %v1495_v41, %v163_v28  ;;  %1245 = vmatprep.subr.mxu0 %v1304_v5  ;;  %v146_v2 = vsel %vm1985_vm3, %v1502_v50, %v140_v29  ;;  %v452_v41 = vadd.s32 256, %v1561_v38  ;;  %vm545_vm9 = vmand %vm535_vm14, %vm540_vm15 }
  0xca   :  { %1246 = vmatpush3.msra.mxu0 %v169_v3  ;;  %v459_v3 = vcvt.s32.f32 %v454_v25 }
  0xcb   :  { %1247 = vmatprep.subr.mxu0 %v1304_v5  ;;  %v457_v43 = vcvt.s32.f32 %v452_v41 }
  0xcc   :  { %v117_v23 = vpop.permute.xlu0 %116  ;;  %v94_v30 = vpop.permute.xlu1 %93  ;;  %1248 = vmatpush3.msra.mxu0 %v146_v2 }
  0xcd   :  { %v123_v31 = vsel %vm1984_vm4, %v1509_v59, %v117_v23  ;;  %1249 = vmatprep.subr.mxu0 %v1304_v5  ;;  %v100_v32 = vsel %vm95_vm5, %v92_v11, %v94_v30  ;;  %v453_v11 = vadd.s32 384, %v1561_v38  ;;  %v506_v30 = vmul.f32 18.0, %v501_v27 }
  0xce   :  { %1250 = vmatpush3.msra.mxu0 %v123_v31 }
  0xcf   :  { %1251 = vmatprep.subr.mxu0 %v1304_v5  ;;  %v458_v14 = vcvt.s32.f32 %v453_v11 }
  0xd0   :  { %v71_v33 = vpop.permute.xlu0 %70  ;;  %v48_v34 = vpop.permute.xlu1 %47  ;;  %1252 = vmatpush3.msra.mxu0 %v100_v32 }
  0xd1   :  { %v77_v35 = vsel %vm72_vm6, %v69_v18, %v71_v33  ;;  %1253 = vmatprep.subr.mxu0 %v1304_v5  ;;  %v54_v36 = vsel %vm49_vm7, %v46_v0, %v48_v34  ;;  %v464_v33 = vadd.f32 19.0, %v459_v3 }
  0xd2   :  { %1254 = vmatpush3.msra.mxu0 %v77_v35  ;;  %v511_v35 = vsub.f32 %v486_v15, %v506_v30 }
  0xd3   :  { %1255 = vmatprep.subr.mxu0 %v1304_v5  ;;  %v469_v37 = vadd.f32 0.5, %v464_v33 }
  0xd4   :  { %1256 = vmatpush3.msra.mxu0 %v54_v36 }
  0xd5   :  { %1257 = vmatprep.subr.mxu0 %v1304_v5  ;;  %v1596_v39 = vmul.f32 0.0030864198, %v469_v37 }
  0xd6   :  { %1258 = vmatpush3.msra.mxu0 %v1378_v4  ;;  %v462_v4 = vadd.f32 19.0, %v457_v43 }
  0xd7   :  { %1260 = vmatmul.mubr.msk.f32.vlgmr.msra.gmra.mxu0 %vm1983_vm8, %v221_v16  ;;  %vm550_vm8 = vcmp.le.f32.partialorder %v475_v45, 1.0  ;;  %v463_v16 = vadd.f32 19.0, %v458_v14  ;;  %v479_v42 = vfloor.f32 %v1596_v39 }
  0xd8   :  { %1099 = vmatprep.mubr.f32.mxu0 %v1304_v5  ;;  %v467_v46 = vadd.f32 0.5, %v462_v4  ;;  %vm555_vm2 = vmand %vm545_vm9, %vm550_vm8  ;;  %vm531_vm9 = vcmp.ge.f32.partialorder %v511_v35, 1.0 }
  0xd9   :  { %v560_v18 = vsel %vm555_vm2, 1, %v1306_v7  ;;  %v468_v21 = vadd.f32 0.5, %v463_v16 }
  0xda   :  { %v472_v48 = vmul.f32 0.0030864198, %v467_v46  ;;  %vm565_vm14 = vcmp.eq.s32.totalorder %v560_v18, 1 }
  0xdb   :  { %v1576_v1 = vmul.f32 0.0030864198, %v468_v21 }
  0xdc   :  { %v477_v50 = vfloor.f32 %v472_v48 }
  0xdd   :  { %v1572_v17 = vpop.permute.xlu0 %225  ;;  %v478_v29 = vfloor.f32 %v1576_v1 }
  0xde   :  { %v482_v53 = vmul.f32 324.0, %v477_v50  ;;  %vm552_vm1 = vcmp.le.f32.partialorder %v477_v50, 1.0 }
  0xdf   :  { %v483_v32 = vmul.f32 324.0, %v478_v29 }
  0xe0   :  { %v487_v56 = vsub.f32 %v462_v4, %v482_v53  ;;  %v484_v4 = vmul.f32 324.0, %v479_v42 }
  0xe1   :  { %v488_v36 = vsub.f32 %v463_v16, %v483_v32 }
  0xe2   :  { %v492_v59 = vadd.f32 0.5, %v487_v56  ;;  %v489_v49 = vsub.f32 %v464_v33, %v484_v4 }
  0xe3   :  { %v493_v38 = vadd.f32 0.5, %v488_v36 }
  0xe4   :  { %v497_v62 = vmul.f32 0.055555556, %v492_v59  ;;  %v494_v52 = vadd.f32 0.5, %v489_v49 }
  0xe5   :  { %v498_v41 = vmul.f32 0.055555556, %v493_v38 }
  0xe6   :  { %v502_v8 = vfloor.f32 %v497_v62  ;;  %v499_v54 = vmul.f32 0.055555556, %v494_v52 }
  0xe7   :  { %v503_v44 = vfloor.f32 %v498_v41 }
  0xe8   :  { %v507_v10 = vmul.f32 18.0, %v502_v8  ;;  %vm517_vm4 = vcmp.ge.f32.partialorder %v502_v8, 1.0  ;;  %vm522_vm3 = vcmp.le.f32.partialorder %v502_v8, 16.0  ;;  %v504_v55 = vfloor.f32 %v499_v54 }
  0xe9   :  { %vm527_vm10 = vmand %vm517_vm4, %vm522_vm3  ;;  %vm521_vm4 = vcmp.le.f32.partialorder %v501_v27, 16.0  ;;  %v508_v48 = vmul.f32 18.0, %v503_v44 }
  0xea   :  { %v512_v13 = vsub.f32 %v487_v56, %v507_v10  ;;  %v509_v57 = vmul.f32 18.0, %v504_v55  ;;  %v1671_v10 = vpop.permute.xlu1 %732 }
  0xeb   :  { %v513_v51 = vsub.f32 %v488_v36, %v508_v48 }
  0xec   :  { %vm532_vm11 = vcmp.ge.f32.partialorder %v512_v13, 1.0  ;;  %vm542_vm13 = vcmp.le.f32.partialorder %v512_v13, 16.0  ;;  %v514_v60 = vsub.f32 %v489_v49, %v509_v57 }
  0xed   :  { %vm537_vm12 = vmand %vm527_vm10, %vm532_vm11  ;;  %vm541_vm11 = vcmp.le.f32.partialorder %v511_v35, 16.0 }
  0xee   :  { %vm547_vm15 = vmand %vm537_vm12, %vm542_vm13  ;;  %vm551_vm13 = vcmp.le.f32.partialorder %v476_v9, 1.0  ;;  %v1673_v12 = vpop.permute.xlu1 %698 }
  0xef   :  { %vm557_vm3 = vmand %vm547_vm15, %vm552_vm1  ;;  %vm516_vm1 = vcmp.ge.f32.partialorder %v501_v27, 1.0 }
  0xf0   :  { %v562_v28 = vsel %vm557_vm3, 1, %v1306_v7  ;;  %vm526_vm8 = vmand %vm516_vm1, %vm521_vm4  ;;  %vm518_vm3 = vcmp.ge.f32.partialorder %v503_v44, 1.0  ;;  %vm533_vm4 = vcmp.ge.f32.partialorder %v513_v51, 1.0 }
  0xf1   :  { %vm567_vm2 = vcmp.eq.s32.totalorder %v562_v28, 1  ;;  %vm536_vm10 = vmand %vm526_vm8, %vm531_vm9  ;;  %vm543_vm9 = vcmp.le.f32.partialorder %v513_v51, 16.0 }
  0xf2   :  { %vm546_vm12 = vmand %vm536_vm10, %vm541_vm11  ;;  %vm553_vm11 = vcmp.le.f32.partialorder %v478_v29, 1.0  ;;  %v1675_v14 = vpop.permute.xlu1 %753 }
 0x17d   :  { %v298_v19 = vpop.f32.mrf.mxu0 }
 0x17e   :  { %v299_v0 = vadd.f32 %v298_v19, %v1572_v17 }
 0x17f   :  { %v300_v40 = vpop.f32.mrf.mxu0 }
 0x180   :  { %v444_v22 = vmax.f32 %v299_v0, 0.0  ;;  %v301_v46 = vadd.f32 %v300_v40, %v1572_v17 }
 0x182   :  { %v1579_v26 = vsel %vm565_vm14, %v444_v22, 0.0  ;;  %vm556_vm14 = vmand %vm546_vm12, %vm551_vm13  ;;  %v445_v50 = vmax.f32 %v301_v46, 0.0  ;;  %vm519_vm13 = vcmp.ge.f32.partialorder %v504_v55, 1.0 }
 0x183   :  { %722 = vrot.lane.b32.xlu1 %v1579_v26, %s1297_s22  ;;  %v561_v47 = vsel %vm556_vm14, 1, %v1306_v7  ;;  %vm524_vm14 = vcmp.le.f32.partialorder %v504_v55, 16.0 }
 0x184   :  { %vm566_vm15 = vcmp.eq.s32.totalorder %v561_v47, 1 }
 0x185   :  { %v571_v53 = vsel %vm566_vm15, %v445_v50, 0.0 }
 0x186   :  { %v369_v2 = vpop.f32.mrf.mxu1 }
 0x187   :  { %v370_v23 = vadd.f32 %v369_v2, %v1572_v17  ;;  %705 = vrot.lane.b32.xlu1 %v1579_v26, %s1298_s25 }
 0x188   :  { %v371_v56 = vpop.f32.mrf.mxu1 }
 0x189   :  { %v446_v31 = vmax.f32 %v370_v23, 0.0  ;;  %v372_v58 = vadd.f32 %v371_v56, %v1572_v17 }
 0x18b   :  { %v572_v34 = vsel %vm567_vm2, %v446_v31, 0.0  ;;  %vm523_vm2 = vcmp.le.f32.partialorder %v503_v44, 16.0  ;;  %v447_v61 = vmax.f32 %v372_v58, 0.0 }
 0x18c   :  { %726 = vrot.lane.b32.xlu0 %v572_v34, %s1297_s22  ;;  %709 = vrot.lane.b32.xlu1 %v572_v34, %s1298_s25  ;;  %vm528_vm1 = vmand %vm518_vm3, %vm523_vm2  ;;  %vm534_vm2 = vcmp.ge.f32.partialorder %v514_v60, 1.0 }
 0x18d   :  { %vm538_vm8 = vmand %vm528_vm1, %vm533_vm4  ;;  %vm544_vm4 = vcmp.le.f32.partialorder %v514_v60, 16.0 }
 0x18e   :  { %vm548_vm10 = vmand %vm538_vm8, %vm543_vm9  ;;  %vm554_vm9 = vcmp.le.f32.partialorder %v479_v42, 1.0 }
 0x18f   :  { %vm558_vm12 = vmand %vm548_vm10, %vm553_vm11 }
 0x190   :  { %688 = vrot.lane.b32.xlu0 %v1579_v26, %s1299_s26  ;;  %671 = vrot.lane.b32.xlu1 %v1579_v26, %s1300_s6  ;;  %v563_v59 = vsel %vm558_vm12, 1, %v1306_v7  ;;  %vm529_vm3 = vmand %vm519_vm13, %vm524_vm14  ;;  %vm1988_vm12 = vcmask 744448   ;;  %vm1990_vm14 = vcmask 752640  }
 0x191   :  { %vm568_vm15 = vcmp.eq.s32.totalorder %v563_v59, 1  ;;  %vm539_vm1 = vmand %vm529_vm3, %vm534_vm2  ;;  %vm1992_vm3 = vcmask 883712  }
 0x192   :  { %v1630_v62 = vsel %vm568_vm15, %v447_v61, 0.0  ;;  %vm549_vm8 = vmand %vm539_vm1, %vm544_vm4  ;;  %vm861_vm1 = vcmask 154624   ;;  %vm1994_vm4 = vcmask 891904  }
 0x193   :  { %vm559_vm10 = vmand %vm549_vm8, %vm554_vm9 }
 0x194   :  { %692 = vrot.lane.b32.xlu0 %v572_v34, %s1299_s26  ;;  %675 = vrot.lane.b32.xlu1 %v572_v34, %s1300_s6  ;;  %v564_v6 = vsel %vm559_vm10, 1, %v1306_v7  ;;  %v635_v7 = vpop.permute.xlu0 %634  ;;  %vm1989_vm13 = vmmov %vm1988_vm12 }
 0x195   :  { %vm569_vm11 = vcmp.eq.s32.totalorder %v564_v6, 1  ;;  %vm1991_vm15 = vmmov %vm1990_vm14 }
 0x196   :  { %vm1993_vm2 = vmmov %vm1992_vm3 }
 0x197   :  { %v440_v43 = vpop.f32.mrf.mxu0  ;;  %vm1995_vm8 = vmmov %vm1994_vm4 }
 0x198   :  { %651 = vrot.lane.b32.xlu0 %v1579_v26, %s1301_s7  ;;  %636 = vrot.lane.b32.xlu1 %v1579_v26, %s1302_s8  ;;  %v441_v63 = vadd.f32 %v440_v43, %v1572_v17  ;;  %v618_v11 = vpop.permute.xlu0 %617  ;;  %vm1996_vm9 = vmmov %vm1988_vm12 }
 0x199   :  { %v1261_v45 = vpop.f32.mrf.mxu0  ;;  %vm1997_vm10 = vmmov %vm1993_vm2 }
 0x19a   :  { %v448_v8 = vmax.f32 %v441_v63, 0.0 }
 0x19c   :  { %655 = vrot.lane.b32.xlu0 %v572_v34, %s1301_s7  ;;  %640 = vrot.lane.b32.xlu1 %v572_v34, %s1302_s8  ;;  %v1647_v9 = vsel %vm569_vm11, %v448_v8, 0.0  ;;  %v601_v13 = vpop.permute.xlu0 %600  ;;  %vm1998_vm11 = vmmov %vm1990_vm14 }
 0x1a0   :  { %759 = vrot.lane.b32.xlu0 %v572_v34, %s1308_s1  ;;  %619 = vrot.lane.b32.xlu1 %v1579_v26, %s1303_s9  ;;  %v1677_v15 = vpop.permute.xlu0 %715 }
 0x1a4   :  { %707 = vrot.lane.b32.xlu0 %v571_v53, %s1298_s25  ;;  %623 = vrot.lane.b32.xlu1 %v572_v34, %s1303_s9  ;;  %v1680_v17 = vpop.permute.xlu0 %681 }
 0x1a8   :  { %673 = vrot.lane.b32.xlu0 %v571_v53, %s1300_s6  ;;  %602 = vrot.lane.b32.xlu1 %v1579_v26, %s1305_s10 }
 0x1ac   :  { %638 = vrot.lane.b32.xlu0 %v571_v53, %s1302_s8  ;;  %606 = vrot.lane.b32.xlu1 %v572_v34, %s1305_s10 }
 0x1b0   :  { %621 = vrot.lane.b32.xlu0 %v571_v53, %s1303_s9  ;;  %755 = vrot.lane.b32.xlu1 %v1579_v26, %s1308_s1 }
 0x1b4   :  { %604 = vrot.lane.b32.xlu0 %v571_v53, %s1305_s10  ;;  %724 = vrot.lane.b32.xlu1 %v571_v53, %s1297_s22 }
 0x1b8   :  { %728 = vrot.lane.b32.xlu0 %v1630_v62, %s1297_s22  ;;  %690 = vrot.lane.b32.xlu1 %v571_v53, %s1299_s26 }
 0x1bc   :  { %677 = vrot.lane.b32.xlu0 %v1630_v62, %s1300_s6  ;;  %653 = vrot.lane.b32.xlu1 %v571_v53, %s1301_s7 }
 0x1c0   :  { %642 = vrot.lane.b32.xlu0 %v1630_v62, %s1302_s8  ;;  %711 = vrot.lane.b32.xlu1 %v1630_v62, %s1298_s25 }
 0x1c4   :  { %757 = vrot.lane.b32.xlu0 %v571_v53, %s1308_s1  ;;  %694 = vrot.lane.b32.xlu1 %v1630_v62, %s1299_s26 }
 0x1c8   :  { %713 = vrot.lane.b32.xlu0 %v1647_v9, %s1298_s25  ;;  %657 = vrot.lane.b32.xlu1 %v1630_v62, %s1301_s7 }
 0x1cc   :  { %696 = vrot.lane.b32.xlu0 %v1647_v9, %s1299_s26  ;;  %625 = vrot.lane.b32.xlu1 %v1630_v62, %s1303_s9 }
 0x1d0   :  { %659 = vrot.lane.b32.xlu0 %v1647_v9, %s1301_s7  ;;  %608 = vrot.lane.b32.xlu1 %v1630_v62, %s1305_s10 }
 0x1d4   :  { %627 = vrot.lane.b32.xlu0 %v1647_v9, %s1303_s9  ;;  %730 = vrot.lane.b32.xlu1 %v1647_v9, %s1297_s22 }
 0x1d8   :  { %610 = vrot.lane.b32.xlu0 %v1647_v9, %s1305_s10  ;;  %679 = vrot.lane.b32.xlu1 %v1647_v9, %s1300_s6 }
 0x1dc   :  { %644 = vrot.lane.b32.xlu1 %v1647_v9, %s1302_s8 }
 0x1f5   :  { %v723_v16 = vpop.permute.xlu1 %722 }
 0x1f6   :  { %849 = vrot.lane.b32.xlu1 %v723_v16, %s1308_s1 }
 0x1f9   :  { %v706_v18 = vpop.permute.xlu1 %705 }
 0x1fa   :  { %837 = vrot.lane.b32.xlu0 %v706_v18, %s1308_s1 }
 0x1fe   :  { %v1683_v19 = vpop.permute.xlu0 %726  ;;  %v1685_v20 = vpop.permute.xlu1 %709 }
 0x202   :  { %v689_v21 = vpop.permute.xlu0 %688  ;;  %v672_v0 = vpop.permute.xlu1 %671 }
 0x203   :  { %825 = vrot.lane.b32.xlu1 %v689_v21, %s1308_s1  ;;  %813 = vrot.lane.b32.xlu0 %v672_v0, %s1308_s1 }
 0x206   :  { %v1689_v22 = vpop.permute.xlu0 %692  ;;  %v1691_v24 = vpop.permute.xlu1 %675 }
 0x20a   :  { %v652_v1 = vpop.permute.xlu0 %651  ;;  %v637_v25 = vpop.permute.xlu1 %636 }
 0x20b   :  { %v646_v26 = vsel %vm95_vm5, %v635_v7, %v637_v25  ;;  %801 = vrot.lane.b32.xlu1 %v652_v1, %s1308_s1 }
 0x20c   :  { %789 = vrot.lane.b32.xlu0 %v646_v26, %s1308_s1 }
 0x20e   :  { %v1696_v27 = vpop.permute.xlu0 %655  ;;  %v1698_v28 = vpop.permute.xlu1 %640 }
 0x212   :  { %v1700_v29 = vpop.permute.xlu0 %759  ;;  %v620_v3 = vpop.permute.xlu1 %619 }
 0x213   :  { %v629_v2 = vsel %vm72_vm6, %v618_v11, %v620_v3 }
 0x214   :  { %777 = vrot.lane.b32.xlu1 %v629_v2, %s1308_s1 }
 0x216   :  { %v708_v23 = vpop.permute.xlu0 %707  ;;  %v1704_v30 = vpop.permute.xlu1 %623 }
 0x217   :  { %v717_v44 = vsel %vm1988_vm12, %v706_v18, %v708_v23  ;;  %v718_v4 = vsel %vm1989_vm13, %v708_v23, %v1685_v20  ;;  %vm1999_vm12 = vmmov %vm1994_vm4 }
 0x218   :  { %vm2000_vm13 = vmmov %vm1996_vm9 }
 0x21a   :  { %v674_v31 = vpop.permute.xlu0 %673  ;;  %v603_v32 = vpop.permute.xlu1 %602 }
 0x21b   :  { %v612_v33 = vsel %vm49_vm7, %v601_v13, %v603_v32  ;;  %v683_v51 = vsel %vm1992_vm3, %v672_v0, %v674_v31  ;;  %v684_v52 = vsel %vm1993_vm2, %v674_v31, %v1691_v24  ;;  %vm2003_vm3 = vmmov %vm1993_vm2 }
 0x21c   :  { %765 = vrot.lane.b32.xlu0 %v612_v33, %s1308_s1  ;;  %vm2004_vm2 = vmmov %vm1998_vm11 }
 0x21e   :  { %v639_v34 = vpop.permute.xlu0 %638  ;;  %v1708_v35 = vpop.permute.xlu1 %606 }
 0x21f   :  { %v647_v59 = vsel %vm95_vm5, %v637_v25, %v639_v34  ;;  %v648_v60 = vsel %vm95_vm5, %v639_v34, %v1698_v28 }
 0x222   :  { %v622_v36 = vpop.permute.xlu0 %621  ;;  %v1710_v37 = vpop.permute.xlu1 %755 }
 0x223   :  { %v630_v61 = vsel %vm72_vm6, %v620_v3, %v622_v36  ;;  %v631_v63 = vsel %vm72_vm6, %v622_v36, %v1704_v30 }
 0x226   :  { %v605_v38 = vpop.permute.xlu0 %604  ;;  %v725_v39 = vpop.permute.xlu1 %724 }
 0x227   :  { %v734_v40 = vsel %vm210_vm0, %v723_v16, %v725_v39  ;;  %v735_v41 = vsel %vm210_vm0, %v725_v39, %v1683_v19  ;;  %v613_v8 = vsel %vm49_vm7, %v603_v32, %v605_v38  ;;  %v614_v7 = vsel %vm49_vm7, %v605_v38, %v1708_v35  ;;  %v741_v39 = vld [vmem:[%s1980_s4] sm:$0xff] }
 0x228   :  { %853 = vrot.lane.b32.xlu0 %v735_v41, %s1308_s1  ;;  %851 = vrot.lane.b32.xlu1 %v734_v40, %s1308_s1 }
 0x22a   :  { %v1717_v42 = vpop.permute.xlu0 %728  ;;  %v691_v43 = vpop.permute.xlu1 %690 }
 0x22b   :  { %v700_v47 = vsel %vm1990_vm14, %v689_v21, %v691_v43  ;;  %v701_v48 = vsel %vm1991_vm15, %v691_v43, %v1689_v22  ;;  %v736_v13 = vsel %vm210_vm0, %v1683_v19, %v1717_v42  ;;  %vm2001_vm14 = vmmov %vm1998_vm11 }
 0x22c   :  { %839 = vrot.lane.b32.xlu0 %v717_v44, %s1308_s1  ;;  %841 = vrot.lane.b32.xlu1 %v718_v4, %s1308_s1  ;;  %vm2002_vm15 = vmmov %vm1996_vm9 }
 0x22e   :  { %v1724_v45 = vpop.permute.xlu0 %677  ;;  %v654_v46 = vpop.permute.xlu1 %653 }
 0x22f   :  { %v661_v55 = vsel %vm1994_vm4, %v652_v1, %v654_v46  ;;  %v662_v56 = vsel %vm1995_vm8, %v654_v46, %v1696_v27  ;;  %v685_v18 = vsel %vm1997_vm10, %v1691_v24, %v1724_v45 }
 0x230   :  { %829 = vrot.lane.b32.xlu0 %v701_v48, %s1308_s1  ;;  %827 = vrot.lane.b32.xlu1 %v700_v47, %s1308_s1 }
 0x232   :  { %v1731_v49 = vpop.permute.xlu0 %642  ;;  %v712_v50 = vpop.permute.xlu1 %711 }
 0x233   :  { %v719_v16 = vsel %vm1996_vm9, %v1685_v20, %v712_v50  ;;  %v649_v19 = vsel %vm95_vm5, %v1698_v28, %v1731_v49 }
 0x234   :  { %815 = vrot.lane.b32.xlu0 %v683_v51, %s1308_s1  ;;  %817 = vrot.lane.b32.xlu1 %v684_v52, %s1308_s1 }
 0x236   :  { %v1738_v53 = vpop.permute.xlu0 %757  ;;  %v695_v54 = vpop.permute.xlu1 %694 }
 0x237   :  { %v1746_v57 = vsel %vm861_vm1, %v1710_v37, %v1738_v53  ;;  %v702_v21 = vsel %vm1998_vm11, %v1689_v22, %v695_v54 }
 0x238   :  { %805 = vrot.lane.b32.xlu0 %v662_v56, %s1308_s1  ;;  %803 = vrot.lane.b32.xlu1 %v661_v55, %s1308_s1 }
 0x23a   :  { %v658_v58 = vpop.permute.xlu1 %657  ;;  %v714_v0 = vpop.permute.xlu0 %713 }
 0x23b   :  { %v663_v20 = vsel %vm1999_vm12, %v1696_v27, %v658_v58  ;;  %v720_v27 = vsel %vm2000_vm13, %v712_v50, %v714_v0  ;;  %v721_v31 = vsel %vm2002_vm15, %v714_v0, %v1677_v15 }
 0x23c   :  { %791 = vrot.lane.b32.xlu0 %v647_v59, %s1308_s1  ;;  %793 = vrot.lane.b32.xlu1 %v648_v60, %s1308_s1 }
 0x23e   :  { %v626_v6 = vpop.permute.xlu1 %625  ;;  %v697_v24 = vpop.permute.xlu0 %696 }
 0x23f   :  { %v632_v22 = vsel %vm72_vm6, %v1704_v30, %v626_v6  ;;  %v703_v23 = vsel %vm2001_vm14, %v695_v54, %v697_v24  ;;  %v704_v34 = vsel %vm2004_vm2, %v697_v24, %v1673_v12 }
 0x240   :  { %781 = vrot.lane.b32.xlu0 %v631_v63, %s1308_s1  ;;  %779 = vrot.lane.b32.xlu1 %v630_v61, %s1308_s1 }
 0x242   :  { %v609_v11 = vpop.permute.xlu1 %608  ;;  %v660_v28 = vpop.permute.xlu0 %659 }
 0x243   :  { %v615_v26 = vsel %vm49_vm7, %v1708_v35, %v609_v11 }
 0x244   :  { %767 = vrot.lane.b32.xlu0 %v613_v8, %s1308_s1  ;;  %769 = vrot.lane.b32.xlu1 %v614_v7, %s1308_s1 }
 0x246   :  { %v731_v1 = vpop.permute.xlu1 %730  ;;  %v628_v33 = vpop.permute.xlu0 %627 }
 0x247   :  { %v737_v2 = vsel %vm210_vm0, %v1717_v42, %v731_v1  ;;  %v738_v30 = vsel %vm210_vm0, %v731_v1, %v1671_v10  ;;  %v664_v10 = vsel %vm1994_vm4, %v658_v58, %v660_v28  ;;  %vm2005_vm0 = vmmov %vm2003_vm3  ;;  %v633_v38 = vsel %vm72_vm6, %v626_v6, %v628_v33 }
 0x248   :  { %855 = vrot.lane.b32.xlu0 %v736_v13, %s1308_s1  ;;  %843 = vrot.lane.b32.xlu1 %v719_v16, %s1308_s1 }
 0x24a   :  { %v680_v25 = vpop.permute.xlu1 %679  ;;  %v611_v36 = vpop.permute.xlu0 %610 }
 0x24b   :  { %v686_v32 = vsel %vm2003_vm3, %v1724_v45, %v680_v25  ;;  %v687_v15 = vsel %vm2005_vm0, %v680_v25, %v1680_v17  ;;  %v616_v12 = vsel %vm49_vm7, %v609_v11, %v611_v36  ;;  %v742_v17 = vld [vmem:[%s1980_s4 + $0x8] sm:$0xff] }
 0x24c   :  { %819 = vrot.lane.b32.xlu1 %v685_v18, %s1308_s1  ;;  %831 = vrot.lane.b32.xlu0 %v702_v21, %s1308_s1 }
 0x24e   :  { %v645_v3 = vpop.permute.xlu1 %644 }
 0x24f   :  { %v650_v35 = vsel %vm95_vm5, %v1731_v49, %v645_v3  ;;  %vm2006_vm5 = vcmask 588800  }
 0x250   :  { %795 = vrot.lane.b32.xlu1 %v649_v19, %s1308_s1  ;;  %807 = vrot.lane.b32.xlu0 %v663_v20, %s1308_s1  ;;  %vm2007_vm6 = vmmov %vm2006_vm5 }
 0x251   :  { %vm2008_vm7 = vmmov %vm2006_vm5 }
 0x252   :  { %vm2009_vm8 = vmmov %vm2006_vm5 }
 0x253   :  { %vm2010_vm9 = vmmov %vm2006_vm5 }
 0x254   :  { %783 = vrot.lane.b32.xlu0 %v632_v22, %s1308_s1  ;;  %771 = vrot.lane.b32.xlu1 %v615_v26, %s1308_s1  ;;  %vm2011_vm10 = vmmov %vm2006_vm5 }
 0x258   :  { %811 = vrot.lane.b32.xlu0 %v660_v28, %s1308_s1  ;;  %799 = vrot.lane.b32.xlu1 %v645_v3, %s1308_s1  ;;  %v1880_v28 = vld [vmem:[%s1981_s3] sm:$0xff]  ;;  %v862_v3 = vsel %vm861_vm1, %v1675_v14, %v1710_v37 }
 0x25c   :  { %845 = vrot.lane.b32.xlu0 %v720_v27, %s1308_s1  ;;  %857 = vrot.lane.b32.xlu1 %v737_v2, %s1308_s1 }
 0x260   :  { %859 = vrot.lane.b32.xlu0 %v738_v30, %s1308_s1  ;;  %833 = vrot.lane.b32.xlu1 %v703_v23, %s1308_s1  ;;  %v1892_v23 = vld [vmem:[%s1981_s3 + $0x8] sm:$0xff] }
 0x264   :  { %821 = vrot.lane.b32.xlu0 %v686_v32, %s1308_s1  ;;  %847 = vrot.lane.b32.xlu1 %v721_v31, %s1308_s1 }
 0x268   :  { %835 = vrot.lane.b32.xlu0 %v704_v34, %s1308_s1  ;;  %809 = vrot.lane.b32.xlu1 %v664_v10, %s1308_s1  ;;  %v850_v40 = vpop.permute.xlu1 %849 }
 0x26c   :  { %797 = vrot.lane.b32.xlu0 %v650_v35, %s1308_s1  ;;  %823 = vrot.lane.b32.xlu1 %v687_v15, %s1308_s1  ;;  %v838_v41 = vpop.permute.xlu0 %837 }
 0x270   :  { %773 = vrot.lane.b32.xlu0 %v616_v12, %s1308_s1  ;;  %785 = vrot.lane.b32.xlu1 %v633_v38, %s1308_s1 }
 0x274   :  { %787 = vrot.lane.b32.xlu0 %v628_v33, %s1308_s1  ;;  %761 = vrot.lane.b32.xlu1 %v1630_v62, %s1308_s1 }
 0x275   :  { %v814_v42 = vpop.permute.xlu0 %813  ;;  %v826_v43 = vpop.permute.xlu1 %825 }
 0x278   :  { %763 = vrot.lane.b32.xlu0 %v1647_v9, %s1308_s1  ;;  %775 = vrot.lane.b32.xlu1 %v611_v36, %s1308_s1 }
 0x27c   :  { %750 = vperm.xlu0 %1295, %v742_v17   ;;  %745 = vperm.xlu1 %1296, %v741_v39  }
 0x27d   :  { %v802_v62 = vpop.permute.xlu1 %801 }
 0x27e   :  { %v790_v44 = vpop.permute.xlu0 %789 }
 0x286   :  { %v778_v4 = vpop.permute.xlu1 %777 }
 0x28e   :  { %v766_v9 = vpop.permute.xlu0 %765 }
 0x29a   :  { %v1837_v45 = vpop.permute.xlu0 %853  ;;  %v852_v46 = vpop.permute.xlu1 %851 }
 0x29b   :  { %v902_v47 = vsel %vm861_vm1, %v850_v40, %v852_v46  ;;  %v903_v48 = vsel %vm861_vm1, %v852_v46, %v1837_v45 }
 0x29c   :  { %972 = vmatprep.subr.mxu1 %v903_v48 }
 0x29d   :  { %973 = vmatpush1.msra.mxu1 %v902_v47 }
 0x29e   :  { %v840_v49 = vpop.permute.xlu0 %839  ;;  %v1842_v50 = vpop.permute.xlu1 %841 }
 0x29f   :  { %v897_v51 = vsel %vm861_vm1, %v838_v41, %v840_v49  ;;  %v898_v52 = vsel %vm861_vm1, %v840_v49, %v1842_v50 }
 0x2a0   :  { %974 = vmatprep.subr.mxu1 %v898_v52 }
 0x2a1   :  { %975 = vmatpush1.msra.mxu1 %v897_v51 }
 0x2a2   :  { %v1847_v54 = vpop.permute.xlu0 %829  ;;  %v828_v55 = vpop.permute.xlu1 %827 }
 0x2a3   :  { %v892_v56 = vsel %vm861_vm1, %v826_v43, %v828_v55  ;;  %v893_v58 = vsel %vm861_vm1, %v828_v55, %v1847_v54 }
 0x2a4   :  { %976 = vmatprep.subr.mxu1 %v893_v58 }
 0x2a5   :  { %977 = vmatpush1.msra.mxu1 %v892_v56 }
 0x2a6   :  { %v816_v59 = vpop.permute.xlu0 %815  ;;  %v1852_v60 = vpop.permute.xlu1 %817 }
 0x2a7   :  { %v887_v61 = vsel %vm861_vm1, %v814_v42, %v816_v59  ;;  %v888_v63 = vsel %vm861_vm1, %v816_v59, %v1852_v60 }
 0x2a8   :  { %978 = vmatprep.subr.mxu1 %v888_v63 }
 0x2a9   :  { %979 = vmatpush1.msra.mxu1 %v887_v61 }
 0x2aa   :  { %v1857_v6 = vpop.permute.xlu0 %805  ;;  %v804_v8 = vpop.permute.xlu1 %803 }
 0x2ab   :  { %v882_v7 = vsel %vm861_vm1, %v802_v62, %v804_v8  ;;  %v883_v11 = vsel %vm861_vm1, %v804_v8, %v1857_v6 }
 0x2ac   :  { %980 = vmatprep.subr.mxu1 %v883_v11 }
 0x2ad   :  { %981 = vmatpush1.msra.mxu1 %v882_v7 }
 0x2ae   :  { %v792_v13 = vpop.permute.xlu0 %791  ;;  %v1862_v16 = vpop.permute.xlu1 %793 }
 0x2af   :  { %v877_v18 = vsel %vm861_vm1, %v790_v44, %v792_v13  ;;  %v878_v21 = vsel %vm861_vm1, %v792_v13, %v1862_v16 }
 0x2b0   :  { %982 = vmatprep.subr.mxu1 %v878_v21 }
 0x2b1   :  { %983 = vmatpush1.msra.mxu1 %v877_v18  ;;  %v864_v18 = vsel %vm861_vm1, %v1738_v53, %v1700_v29 }
 0x2b2   :  { %v1867_v0 = vpop.permute.xlu0 %781  ;;  %v780_v1 = vpop.permute.xlu1 %779 }
 0x2b3   :  { %v872_v19 = vsel %vm861_vm1, %v778_v4, %v780_v1  ;;  %v873_v20 = vsel %vm861_vm1, %v780_v1, %v1867_v0 }
 0x2b4   :  { %984 = vmatprep.subr.mxu1 %v873_v20 }
 0x2b5   :  { %985 = vmatpush1.msra.mxu1 %v872_v19 }
 0x2b6   :  { %v768_v24 = vpop.permute.xlu0 %767  ;;  %v1872_v25 = vpop.permute.xlu1 %769 }
 0x2b7   :  { %v867_v22 = vsel %vm861_vm1, %v766_v9, %v768_v24  ;;  %v868_v26 = vsel %vm861_vm1, %v768_v24, %v1872_v25 }
 0x2b8   :  { %986 = vmatprep.subr.mxu1 %v868_v26 }
 0x2b9   :  { %987 = vmatpush1.msra.mxu1 %v867_v22 }
 0x2ba   :  { %v856_v27 = vpop.permute.xlu0 %855  ;;  %988 = vmatprep.subr.mxu1 %v1746_v57  ;;  %v844_v2 = vpop.permute.xlu1 %843 }
 0x2bb   :  { %989 = vmatpush1.msra.mxu1 %v862_v3  ;;  %v904_v36 = vsel %vm861_vm1, %v1837_v45, %v856_v27  ;;  %v899_v12 = vsel %vm861_vm1, %v1842_v50, %v844_v2 }
 0x2bc   :  { %1214 = vmatmul.mubr.msk.f32.vlgmr.msra.gmra.mxu1 %vm2006_vm5, %v1880_v28 }
 0x2bd   :  { %1028 = vmatprep.mubr.f32.mxu1 %v1304_v5 }
 0x2be   :  { %v832_v30 = vpop.permute.xlu0 %831  ;;  %v820_v31 = vpop.permute.xlu1 %819 }
 0x2bf   :  { %v894_v42 = vsel %vm861_vm1, %v1847_v54, %v832_v30  ;;  %v889_v9 = vsel %vm861_vm1, %v1852_v60, %v820_v31 }
 0x2c0   :  { %1215 = vmatmul.mubr.msk.f32.gmra.mxu1 %vm2007_vm6, %v1892_v23 }
 0x2c1   :  { %1280 = vmatprep.mubr.msk.f32.mxu1 %vm2008_vm7, %v1880_v28 }
 0x2c2   :  { %v808_v14 = vpop.permute.xlu0 %807  ;;  %v796_v37 = vpop.permute.xlu1 %795 }
 0x2c3   :  { %v884_v49 = vsel %vm861_vm1, %v1857_v6, %v808_v14  ;;  %v879_v55 = vsel %vm861_vm1, %v1862_v16, %v796_v37 }
 0x2c6   :  { %v784_v57 = vpop.permute.xlu0 %783  ;;  %v1898_v32 = vpop.permute.xlu1 %771 }
 0x2c7   :  { %v874_v63 = vsel %vm861_vm1, %v1867_v0, %v784_v57  ;;  %v869_v8 = vsel %vm861_vm1, %v1872_v25, %v1898_v32 }
 0x2ca   :  { %v812_v33 = vpop.permute.xlu0 %811  ;;  %v800_v34 = vpop.permute.xlu1 %799 }
 0x2ce   :  { %v846_v10 = vpop.permute.xlu0 %845  ;;  %v858_v15 = vpop.permute.xlu1 %857 }
 0x2cf   :  { %v905_v35 = vsel %vm861_vm1, %v856_v27, %v858_v15  ;;  %v900_v38 = vsel %vm861_vm1, %v844_v2, %v846_v10 }
 0x2d0   :  { %1049 = vmatprep.subr.mxu0 %v905_v35 }
 0x2d1   :  { %1050 = vmatpush1.msra.mxu0 %v904_v36 }
 0x2d2   :  { %v860_v17 = vpop.permute.xlu0 %859  ;;  %1051 = vmatprep.subr.mxu0 %v900_v38  ;;  %v834_v39 = vpop.permute.xlu1 %833 }
 0x2d3   :  { %1052 = vmatpush1.msra.mxu0 %v899_v12  ;;  %v895_v40 = vsel %vm861_vm1, %v832_v30, %v834_v39  ;;  %v906_v41 = vsel %vm861_vm1, %v858_v15, %v860_v17 }
 0x2d4   :  { %1053 = vmatprep.subr.mxu0 %v895_v40  ;;  %1262 = vmatprep.subr.mxu1 %v906_v41 }
 0x2d5   :  { %1054 = vmatpush1.msra.mxu0 %v894_v42  ;;  %1263 = vmatpush3.msra.mxu1 %v906_v41 }
 0x2d6   :  { %v822_v43 = vpop.permute.xlu0 %821  ;;  %v848_v62 = vpop.permute.xlu1 %847 }
 0x2d7   :  { %v890_v44 = vsel %vm861_vm1, %v820_v31, %v822_v43  ;;  %v901_v4 = vsel %vm861_vm1, %v846_v10, %v848_v62 }
 0x2d8   :  { %1055 = vmatprep.subr.mxu0 %v890_v44  ;;  %1264 = vmatprep.subr.mxu1 %v901_v4 }
 0x2d9   :  { %1056 = vmatpush1.msra.mxu0 %v889_v9  ;;  %1265 = vmatpush3.msra.mxu1 %v901_v4 }
 0x2da   :  { %v836_v45 = vpop.permute.xlu0 %835  ;;  %v810_v46 = vpop.permute.xlu1 %809 }
 0x2db   :  { %v885_v47 = vsel %vm861_vm1, %v808_v14, %v810_v46  ;;  %v896_v48 = vsel %vm861_vm1, %v834_v39, %v836_v45  ;;  %v886_v56 = vsel %vm861_vm1, %v810_v46, %v812_v33 }
 0x2dc   :  { %1057 = vmatprep.subr.mxu0 %v885_v47  ;;  %1266 = vmatprep.subr.mxu1 %v896_v48 }
 0x2dd   :  { %1058 = vmatpush1.msra.mxu0 %v884_v49  ;;  %1267 = vmatpush3.msra.mxu1 %v896_v48 }
 0x2de   :  { %v798_v50 = vpop.permute.xlu0 %797  ;;  %v824_v51 = vpop.permute.xlu1 %823 }
 0x2df   :  { %v880_v52 = vsel %vm861_vm1, %v796_v37, %v798_v50  ;;  %v891_v54 = vsel %vm861_vm1, %v822_v43, %v824_v51  ;;  %v881_v61 = vsel %vm861_vm1, %v798_v50, %v800_v34 }
 0x2e0   :  { %1059 = vmatprep.subr.mxu0 %v880_v52  ;;  %1268 = vmatprep.subr.mxu1 %v891_v54 }
 0x2e1   :  { %1060 = vmatpush1.msra.mxu0 %v879_v55  ;;  %1269 = vmatpush3.msra.mxu1 %v891_v54 }
 0x2e2   :  { %v774_v58 = vpop.permute.xlu0 %773  ;;  %1270 = vmatprep.subr.mxu1 %v886_v56  ;;  %v786_v59 = vpop.permute.xlu1 %785 }
 0x2e3   :  { %1271 = vmatpush3.msra.mxu1 %v886_v56  ;;  %v875_v60 = vsel %vm861_vm1, %v784_v57, %v786_v59  ;;  %v870_v6 = vsel %vm861_vm1, %v1898_v32, %v774_v58 }
 0x2e4   :  { %1061 = vmatprep.subr.mxu0 %v875_v60  ;;  %1272 = vmatprep.subr.mxu1 %v881_v61 }
 0x2e5   :  { %1062 = vmatpush1.msra.mxu0 %v874_v63  ;;  %1273 = vmatpush3.msra.mxu1 %v881_v61 }
 0x2e6   :  { %v788_v7 = vpop.permute.xlu0 %787  ;;  %1063 = vmatprep.subr.mxu0 %v870_v6  ;;  %v762_v11 = vpop.permute.xlu1 %761 }
 0x2e7   :  { %1064 = vmatpush1.msra.mxu0 %v869_v8  ;;  %v865_v13 = vsel %vm861_vm1, %v1700_v29, %v762_v11  ;;  %v876_v16 = vsel %vm861_vm1, %v786_v59, %v788_v7 }
 0x2e8   :  { %1065 = vmatprep.subr.mxu0 %v865_v13  ;;  %1274 = vmatprep.subr.mxu1 %v876_v16 }
 0x2e9   :  { %1066 = vmatpush1.msra.mxu0 %v864_v18  ;;  %1275 = vmatpush3.msra.mxu1 %v876_v16 }
 0x2ea   :  { %v764_v21 = vpop.permute.xlu0 %763  ;;  %1216 = vmatmul.mubr.msk.f32.vlgmr.msra.gmra.mxu0 %vm2009_vm8, %v1880_v28  ;;  %v776_v0 = vpop.permute.xlu1 %775 }
 0x2eb   :  { %v871_v1 = vsel %vm861_vm1, %v774_v58, %v776_v0  ;;  %1105 = vmatprep.mubr.f32.mxu0 %v1304_v5  ;;  %v866_v19 = vsel %vm861_vm1, %v762_v11, %v764_v21 }
 0x2ec   :  { %1276 = vmatprep.subr.mxu1 %v871_v1 }
 0x2ed   :  { %1277 = vmatpush3.msra.mxu1 %v871_v1 }
 0x2ee   :  { %1217 = vmatmul.mubr.msk.f32.gmra.mxu0 %vm2010_vm9, %v1892_v23  ;;  %1278 = vmatprep.subr.mxu1 %v866_v19 }
 0x2ef   :  { %1279 = vmatpush3.msra.mxu1 %v866_v19 }
 0x2f0   :  { %1281 = vmatmul.mubr.msk.f32.vlgmr.msra.gmra.mxu1 %vm2011_vm10, %v1892_v23 }
 0x2f7   :  { %v746_v29 = vpop.permute.xlu1 %745  ;;  %v751_v26 = vpop.permute.xlu0 %750 }
 0x37c   :  { %v1024_v53 = vpop.f32.mrf.mxu1 }
 0x37d   :  { %v1025_v20 = vadd.f32 %v1024_v53, %v746_v29 }
 0x37e   :  { %v1026_v24 = vpop.f32.mrf.mxu1 }
 0x37f   :  { %v1027_v25 = vadd.f32 %v1026_v24, %v746_v29  ;;  %v1187_v22 = vmax.f32 %v1025_v20, 0.0 }
 0x380   :  { %v1030_v5 = vpop.f32.mrf.mxu1 }
 0x381   :  { %v1031_v28 = vadd.f32 %v1030_v5, %v751_v26  ;;  %v1188_v3 = vmax.f32 %v1027_v25, 0.0  ;;  %1197 = vst [vmem:[%s1982_s5] sm:$0xff] %v1187_v22 }
 0x382   :  { %v1032_v27 = vpop.f32.mrf.mxu1 }
 0x383   :  { %v1192_v2 = vmax.f32 %v1031_v28, 0.0  ;;  %v1033_v30 = vadd.f32 %v1032_v27, %v751_v26  ;;  %1198 = vst [vmem:[%s1982_s5 + $0x8] sm:$0xff] %v1188_v3 }
 0x385   :  { %1202 = vst [vmem:[%s1982_s5 + $0x28] sm:$0xff] %v1192_v2  ;;  %v1193_v23 = vmax.f32 %v1033_v30, 0.0 }
 0x387   :  { %1203 = vst [vmem:[%s1982_s5 + $0x30] sm:$0xff] %v1193_v23 }
 0x3aa   :  { %v1101_v31 = vpop.f32.mrf.mxu0 }
 0x3ab   :  { %v1102_v14 = vadd.f32 %v1101_v31, %v746_v29 }
 0x3ac   :  { %v1103_v37 = vpop.f32.mrf.mxu0 }
 0x3ad   :  { %v1189_v57 = vmax.f32 %v1102_v14, 0.0  ;;  %v1104_v32 = vadd.f32 %v1103_v37, %v746_v29 }
 0x3ae   :  { %v1107_v33 = vpop.f32.mrf.mxu0 }
 0x3af   :  { %1199 = vst [vmem:[%s1982_s5 + $0x10] sm:$0xff] %v1189_v57  ;;  %v1190_v34 = vmax.f32 %v1104_v32, 0.0  ;;  %v1108_v10 = vadd.f32 %v1107_v33, %v751_v26 }
 0x3b0   :  { %v1109_v15 = vpop.f32.mrf.mxu0  ;;  %v1282_v35 = vpop.f32.mrf.mxu1 }
 0x3b1   :  { %1200 = vst [vmem:[%s1982_s5 + $0x18] sm:$0xff] %v1190_v34  ;;  %v1194_v36 = vmax.f32 %v1108_v10, 0.0  ;;  %v1110_v38 = vadd.f32 %v1109_v15, %v751_v26  ;;  %v1184_v12 = vadd.f32 %v1282_v35, %v751_v26 }
 0x3b2   :  { %v1178_v17 = vpop.f32.mrf.mxu1 }
 0x3b3   :  { %1204 = vst [vmem:[%s1982_s5 + $0x38] sm:$0xff] %v1194_v36  ;;  %v1195_v39 = vmax.f32 %v1110_v38, 0.0  ;;  %v1196_v40 = vmax.f32 %v1184_v12, 0.0  ;;  %v1179_v41 = vadd.f32 %v1178_v17, %v746_v29 }
 0x3b5   :  { %1205 = vst [vmem:[%s1982_s5 + $0x40] sm:$0xff] %v1195_v39  ;;  %1206 = vst [vmem:[%s1982_s5 + $0x48] sm:$0xff] %v1196_v40  ;;  %v1191_v42 = vmax.f32 %v1179_v41, 0.0 }
 0x3b7   :  { %1201 = vst [vmem:[%s1982_s5 + $0x20] sm:$0xff] %v1191_v42 }

</bundles_post_ra>
